<compile_context>
chip_gen: v5e
topology: v5e:2x2
jax: 0.10.0
libtpu: 0.0.40
codegen_flags: <defaults>
</compile_context>

<pallas_src>
import functools

import jax
import jax.numpy as jnp
from jax import lax
from jax.experimental import pallas as pl
from jax.experimental.pallas import tpu as pltpu

_SUB = 8     # f32 min sublane tile
_LANE = 128  # lane tile


def _gmm_forward_kernel(n, ps_ref, out_ref):
    """ps_ref/out_ref are (8, 128) f32: row 0 = pi, row 1 = sigma, rest pad."""
    x = ps_ref[...]                                        # one full-tile load

    # Lane mask: only the first n lanes are real parameters.
    lane = lax.broadcasted_iota(jnp.int32, x.shape, 1)
    valid = lane < n

    # Numerically stable masked softmax over the valid lanes of each row
    # (only row 0 is kept).  Padding uses a large-negative finite value so no
    # inf/NaN can leak through the unselected where-branches.
    xm = jnp.where(valid, x, -1e30)
    m = jnp.max(xm, axis=-1, keepdims=True)
    e = jnp.where(valid, jnp.exp(x - m), 0.0)
    sm = e / jnp.sum(e, axis=-1, keepdims=True)            # exact divide

    # Softplus with PyTorch's threshold=20 behavior; clamp the exp argument so
    # the unselected branch of the where stays finite.
    sp = jnp.where(x > 20.0, x, jnp.log1p(jnp.exp(jnp.minimum(x, 20.0))))

    # Row 0 -> softmax(pi), row 1 -> softplus(sigma); single unmasked full-tile
    # store (lane-dense output).
    row = lax.broadcasted_iota(jnp.int32, x.shape, 0)
    out_ref[...] = jnp.where(row == 0, sm, sp)


@functools.partial(jax.jit, static_argnames=("n",))
def gmm_simple_forward(packed, mu, n):
    """GMMSimple.forward(): (softmax(pi), mu, softplus(sigma)).

    `packed` is the pre-packed (8, 128) f32 slab from pack_params().
    """
    vmem_spec = pl.BlockSpec(memory_space=pltpu.MemorySpace.VMEM)
    out = pl.pallas_call(
        _gmm_forward_kernel.__wrapped__ if hasattr(_gmm_forward_kernel, "__wrapped__")
        else functools.partial(_gmm_forward_kernel, n),
        out_shape=jax.ShapeDtypeStruct((_SUB, _LANE), jnp.float32),
        in_specs=[vmem_spec],
        out_specs=vmem_spec,
        input_output_aliases={0: 0},   # update the packed slab in place
    )(packed)

    pi_out = out[0:1, :n]
    sigma_out = out[1:2, :n]
    # mu is an identity pass-through (never touches the kernel).
    return pi_out, mu, sigma_out


def init_gmm_simple_params(n_components=5):
    """Deterministic parameter init mirroring GMMSimple.__init__ (all f32)."""
    pi = jnp.full((1, n_components), 1.0 / n_components, jnp.float32)
    mu = jnp.linspace(-2.0, 2.0, n_components, dtype=jnp.float32).reshape(1, -1)
    sigma = jnp.full((1, n_components), 1.0 / n_components, jnp.float32)
    return pi, mu, sigma


def pack_params(pi, sigma):
    """One-time packing of pi/sigma into a lane-dense (8, 128) f32 slab."""
    n = pi.shape[-1]
    packed = jnp.zeros((_SUB, _LANE), jnp.float32)
    packed = packed.at[0, :n].set(pi.reshape(-1).astype(jnp.float32))
    packed = packed.at[1, :n].set(sigma.reshape(-1).astype(jnp.float32))
    return packed


if __name__ == "__main__":
    n_components = 5
    pi, mu, sigma = init_gmm_simple_params(n_components)

    # Module forward takes no data input; PRNGKey(0) perturbation just makes
    # the softmax/softplus values non-trivial for the correctness check.
    key = jax.random.PRNGKey(0)
    k1, k2 = jax.random.split(key)
    pi = pi + 0.1 * jax.random.normal(k1, pi.shape, jnp.float32)
    sigma = sigma + 0.1 * jax.random.normal(k2, sigma.shape, jnp.float32)

    # Packing happens once, at "init" time, not per forward call.
    packed = pack_params(pi, sigma)

    pi_out, mu_out, sigma_out = gmm_simple_forward(packed, mu, n_components)
    jax.block_until_ready((pi_out, mu_out, sigma_out))

    # Reference check against plain JAX.
    pi_ref = jax.nn.softmax(pi, axis=-1)
    mu_ref = mu
    sigma_ref = jax.nn.softplus(sigma)

    assert pi_out.shape == (1, n_components)
    assert mu_out.shape == (1, n_components)
    assert sigma_out.shape == (1, n_components)
    assert pi_out.dtype == mu_out.dtype == sigma_out.dtype == jnp.float32
    assert jnp.allclose(pi_out, pi_ref, atol=1e-6, rtol=1e-6)
    assert jnp.allclose(mu_out, mu_ref, atol=1e-6, rtol=1e-6)
    assert jnp.allclose(sigma_out, sigma_ref, atol=1e-6, rtol=1e-6)
    assert jnp.allclose(jnp.sum(pi_out), 1.0, atol=1e-6)

    print("KERNEL_OK")
</pallas_src>

<mosaic_0001>
module attributes {stable_mosaic.version = 11 : i64} {
  func.func @_gmm_forward_kernel(%arg0: memref<8x128xf32, #tpu.memory_space<vmem>>, %arg1: memref<8x128xf32, #tpu.memory_space<vmem>>) attributes {dimension_semantics = [], scalar_prefetch = 0 : i64, scratch_operands = 0 : i64, tpu.core_type = #tpu.core_type<tc>} {
    %c0 = arith.constant 0 : index
    %c0_0 = arith.constant 0 : index
    %0 = vector.load %arg0[%c0, %c0_0] : memref<8x128xf32, #tpu.memory_space<vmem>>, vector<8x128xf32>
    %1 = tpu.iota {dimensions = array<i32: 1>} : vector<8x128xi32>
    %c5_i32 = arith.constant 5 : i32
    %2 = vector.broadcast %c5_i32 : i32 to vector<8x128xi32>
    %3 = arith.cmpi slt, %1, %2 : vector<8x128xi32>
    %cst = arith.constant -1.000000e+30 : f32
    %4 = vector.broadcast %cst : f32 to vector<8x128xf32>
    %5 = arith.select %3, %0, %4 : vector<8x128xi1>, vector<8x128xf32>
    %cst_1 = arith.constant dense<0xFF800000> : vector<8xf32>
    %6 = vector.multi_reduction <maximumf>, %5, %cst_1 [1] : vector<8x128xf32> to vector<8xf32>
    %7 = vector.shape_cast %6 : vector<8xf32> to vector<8x1xf32>
    %8 = vector.broadcast %7 : vector<8x1xf32> to vector<8x128xf32>
    %9 = arith.subf %0, %8 : vector<8x128xf32>
    %10 = math.exp %9 : vector<8x128xf32>
    %cst_2 = arith.constant 0.000000e+00 : f32
    %11 = vector.broadcast %cst_2 : f32 to vector<8x128xf32>
    %12 = arith.select %3, %10, %11 : vector<8x128xi1>, vector<8x128xf32>
    %cst_3 = arith.constant dense<0.000000e+00> : vector<8xf32>
    %13 = vector.multi_reduction <add>, %12, %cst_3 [1] : vector<8x128xf32> to vector<8xf32>
    %14 = vector.shape_cast %13 : vector<8xf32> to vector<8x1xf32>
    %15 = vector.broadcast %14 : vector<8x1xf32> to vector<8x128xf32>
    %16 = arith.divf %12, %15 : vector<8x128xf32>
    %cst_4 = arith.constant 2.000000e+01 : f32
    %17 = vector.broadcast %cst_4 : f32 to vector<8x128xf32>
    %18 = arith.cmpf ogt, %0, %17 : vector<8x128xf32>
    %cst_5 = arith.constant 2.000000e+01 : f32
    %19 = vector.broadcast %cst_5 : f32 to vector<8x128xf32>
    %20 = arith.minimumf %0, %19 : vector<8x128xf32>
    %21 = math.exp %20 : vector<8x128xf32>
    %22 = math.log1p %21 : vector<8x128xf32>
    %23 = arith.select %18, %0, %22 : vector<8x128xi1>, vector<8x128xf32>
    %24 = tpu.iota {dimensions = array<i32: 0>} : vector<8x128xi32>
    %c0_i32 = arith.constant 0 : i32
    %25 = vector.broadcast %c0_i32 : i32 to vector<8x128xi32>
    %26 = arith.cmpi eq, %24, %25 : vector<8x128xi32>
    %27 = arith.select %26, %16, %23 : vector<8x128xi1>, vector<8x128xf32>
    %c0_6 = arith.constant 0 : index
    %c0_7 = arith.constant 0 : index
    %28 = vector.load %arg1[%c0_6, %c0_7] : memref<8x128xf32, #tpu.memory_space<vmem>>, vector<8x128xf32>
    tpu.vector_store %arg1[%c0_6, %c0_7], %27 {strides = array<i32>} : memref<8x128xf32, #tpu.memory_space<vmem>>, vector<8x128xf32>,
    return
  }
}

</mosaic_0001>

<bundles_post_ra>
// kernel: gmm_simple_forward.1
= control target key start
LH: loop header
LB: loop body
LE: loop exit
PB: predicated region body
PF: predicated region fallthrough
CT: control target
= control target key end

     0   :  { %v9_v0 = vlaneseq  ;;  %s89_s0 = inlined_call_operand.vmem [shape: f32[8,128], index: 0, kind: input, shape index: {}, may-alias: {0,1}]   ;;  %s90_s1 = inlined_call_operand.vmem [shape: f32[8,128], index: 1, kind: output, shape index: {}, may-alias: {0,1}]  }
   0x1   :  { %v8_v1 = vld [vmem:[%s89_s0] sm:$0xff] }
   0x2   :  { %v10_v2 = vand.u32 127, %v9_v0  ;;  %v37_v9 = vmin.f32 %v8_v1, 20.0  ;;  %v51_v27 = vshrl.u32 %v9_v0, 7  ;;  %vm36_vm3 = vcmp.gt.f32.partialorder %v8_v1, 20.0 }
   0x4   :  { %vm11_vm0 = vcmp.lt.s32.totalorder %v10_v2, 5  ;;  %v38_v10 = vmul.f32 1.442695, %v37_v9  ;;  %vm52_vm7 = vcmp.eq.s32.totalorder %v51_v27, 0 }
   0x5   :  { %v12_v3 = vsel %vm11_vm0, %v8_v1, -1e+30 }
   0x6   :  { %13 = vmax.xlane.f32.xlu0 %v12_v3 }
  0x79   :  { %v14_v4 = vpop.xlane.xlu0 %13 }
  0x7a   :  { %v15_v5 = vsub.f32 %v8_v1, %v14_v4 }
  0x7c   :  { %v16_v6 = vmul.f32 1.442695, %v15_v5 }
  0x7e   :  { %59 = vpow2.f32 %v16_v6 }
  0x7f   :  { %61 = vpow2.f32 %v38_v10 }
  0x84   :  { %v60_v7 = vpop.eup %59 }
  0x85   :  { %v18_v8 = vsel %vm11_vm0, %v60_v7, 0.0  ;;  %v62_v11 = vpop.eup %61 }
  0x86   :  { %19 = vadd.xlane.f32.xlu0 %v18_v8  ;;  %v40_v12 = vadd.f32 1.0, %v62_v11  ;;  %v43_v14 = vmul.f32 -0.5, %v62_v11  ;;  %v46_v18 = vand.u32 2147483647, %v62_v11 }
  0x88   :  { %63 = vlog2.f32 %v40_v12  ;;  %v44_v16 = vadd.f32 1.0, %v43_v14  ;;  %vm80_vm1 = vcmp.lt.f32.partialorder %v46_v18, 0.0004427343 }
  0x8a   :  { %v45_v21 = vmul.f32 %v62_v11, %v44_v16 }
  0x8e   :  { %v64_v15 = vpop.eup %63 }
  0x8f   :  { %v42_v20 = vmul.f32 0.6931472, %v64_v15 }
  0x91   :  { %v48_v28 = vsel %vm80_vm1, %v45_v21, %v42_v20 }
  0x92   :  { %v49_v32 = vsel %vm36_vm3, %v8_v1, %v48_v28 }
  0xf9   :  { %v20_v13 = vpop.xlane.xlu0 %19 }
  0xfa   :  { %65 = vrcp.f32 %v20_v13  ;;  %v32_v24 = vand.u32 2147483648, %v20_v13  ;;  %v30_v26 = vand.u32 2147483647, %v20_v13  ;;  %vm26_vm4 = vweird.f32 %v20_v13 }
  0xfc   :  { %v33_v30 = vor.u32 1.1754944e-38, %v32_v24  ;;  %vm31_vm6 = vcmp.eq.f32.partialorder %v30_v26, 8.507059e+37 }
 0x100   :  { %v66_v17 = vpop.eup %65 }
 0x101   :  { %v22_v19 = vmul.f32 %v66_v17, %v20_v13  ;;  %vm27_vm2 = vweird.f32 %v66_v17 }
 0x102   :  { %vm28_vm5 = vmor %vm26_vm4, %vm27_vm2 }
 0x103   :  { %v23_v22 = vsub.f32 1.0, %v22_v19 }
 0x105   :  { %v24_v25 = vmul.f32 %v66_v17, %v23_v22 }
 0x107   :  { %v25_v29 = vadd.f32 %v66_v17, %v24_v25 }
 0x109   :  { %v29_v31 = vsel %vm28_vm5, %v66_v17, %v25_v29 }
 0x10a   :  { %v34_v33 = vsel %vm31_vm6, %v33_v30, %v29_v31 }
 0x10b   :  { %v35_v34 = vmul.f32 %v34_v33, %v18_v8 }
 0x10d   :  { %v53_v35 = vsel %vm52_vm7, %v35_v34, %v49_v32 }
 0x10e   :  { %54 = vst [vmem:[%s90_s1] sm:$0xff] %v53_v35 }

</bundles_post_ra>
